<compile_context>
chip_gen: v5e
topology: v5e:2x2
jax: 0.10.0
libtpu: 0.0.40
codegen_flags: <defaults>
</compile_context>

<pallas_src>
import functools

import jax
import jax.numpy as jnp
from jax.experimental import pallas as pl
from jax.experimental.pallas import tpu as pltpu


# ----------------------------------------------------------------------------
# helpers
# ----------------------------------------------------------------------------
def _round_up(x, m):
    return (x + m - 1) // m * m


def _pick_row_tile(m, cap):
    """Row tile: multiple of 16 (bf16 sublane packing), capped at `cap`."""
    m16 = _round_up(m, 16)
    return m16 if m16 <= cap else cap


_VMEM_LIMIT = 32 * 1024 * 1024  # safe on v5e (raises 16 MiB default) and v7x


# ----------------------------------------------------------------------------
# Kernel 1: fused (x @ w + b), optional ReLU, lane-padded output.
# Used for the (fused) FastRCNNPredictor box head.
# ----------------------------------------------------------------------------
def _linear_kernel(x_ref, w_ref, b_ref, o_ref, *, relu):
    acc = jnp.dot(x_ref[...], w_ref[...], preferred_element_type=jnp.float32)
    acc = acc + b_ref[...]
    if relu:
        acc = jnp.maximum(acc, 0.0)
    o_ref[...] = acc.astype(o_ref.dtype)


def pallas_linear(x, w, b, *, relu=False, cap=512):
    """y = relu?(x @ w + b).  x:[M,K] f32, w:[K,N] f32, b:[N] f32 -> [M,N] f32.

    Internally: rows padded to a multiple of the row tile, N padded to a
    multiple of 128 (lane-dense stores), operands cast to bf16, f32 accum.
    """
    m, k = x.shape
    k2, n = w.shape
    assert k == k2
    n_pad = _round_up(n, 128)
    row_tile = _pick_row_tile(m, cap)
    m_pad = _round_up(m, row_tile)

    x_p = jnp.pad(x, ((0, m_pad - m), (0, 0))).astype(jnp.bfloat16)
    w_p = jnp.pad(w, ((0, 0), (0, n_pad - n))).astype(jnp.bfloat16)
    b_p = jnp.pad(b, (0, n_pad - n)).reshape(1, n_pad).astype(jnp.float32)

    out = pl.pallas_call(
        functools.partial(_linear_kernel, relu=relu),
        out_shape=jax.ShapeDtypeStruct((m_pad, n_pad), jnp.float32),
        grid_spec=pltpu.PrefetchScalarGridSpec(
            num_scalar_prefetch=0,
            grid=(m_pad // row_tile,),
            in_specs=[
                pl.BlockSpec((row_tile, k), lambda i: (i, 0)),
                pl.BlockSpec((k, n_pad), lambda i: (0, 0)),
                pl.BlockSpec((1, n_pad), lambda i: (0, 0)),
            ],
            out_specs=pl.BlockSpec((row_tile, n_pad), lambda i: (i, 0)),
        ),
        compiler_params=pltpu.CompilerParams(
            dimension_semantics=("parallel",),
            vmem_limit_bytes=_VMEM_LIMIT),
    )(x_p, w_p, b_p)
    return out[:m, :n]


# ----------------------------------------------------------------------------
# FastRCNNPredictor head (box classification + regression), fused matmul.
# ----------------------------------------------------------------------------
def fast_rcnn_predictor(box_features, params):
    """box_features: [R, 1024] -> (scores [R, C], bbox_deltas [R, 4C])."""
    num_classes = params["cls_w"].shape[1]
    # Concatenate the two heads along N: both read the same x, one MXU pass,
    # one lane-padded output (25 -> 128 lanes) instead of two masked stores.
    w = jnp.concatenate([params["cls_w"], params["bbox_w"]], axis=1)
    b = jnp.concatenate([params["cls_b"], params["bbox_b"]])
    y = pallas_linear(box_features, w, b)
    return y[:, :num_classes], y[:, num_classes:]


# ----------------------------------------------------------------------------
# Kernel 2: fused mask predictor
#   relu(x @ dw + db)  ->  (per 2x2 sub-position) @ lw + lb
# The 4096-wide intermediate stays in VMEM/vregs; output is lane-padded.
# ----------------------------------------------------------------------------
def _mask_head_kernel(x_ref, dw_ref, db_ref, lw_ref, lb_ref, o_ref, *,
                      hidden, kpad):
    # deconv-as-matmul + bias + ReLU, f32 accumulation
    y = jnp.dot(x_ref[...], dw_ref[...], preferred_element_type=jnp.float32)
    y = jnp.maximum(y + db_ref[...], 0.0)          # [tm, 4*hidden] f32
    y = y.astype(lw_ref.dtype)                     # bf16 for the MXU

    lw = lw_ref[...]
    lb = lb_ref[...]
    # 1x1 conv over the hidden axis, one matmul per (dy, dx) sub-position.
    # Static, lane-aligned slices (multiples of 128).
    for j in range(4):
        yj = y[:, j * hidden:(j + 1) * hidden]
        oj = jnp.dot(yj, lw, preferred_element_type=jnp.float32) + lb
        o_ref[:, j * kpad:(j + 1) * kpad] = oj.astype(o_ref.dtype)


def mask_rcnn_predictor(mask_features_nchw, params, num_classes):
    """mask_features: [R, 256, 14, 14] (NCHW) -> mask logits [R, C, 28, 28]."""
    n, c, h, w = mask_features_nchw.shape
    hidden = params["deconv_w"].shape[1]
    kpad = _round_up(num_classes, 128)

    # NCHW -> flattened NHWC rows.
    x = jnp.transpose(mask_features_nchw, (0, 2, 3, 1)).reshape(n * h * w, c)

    # ConvTranspose2d(k=2, s=2) is non-overlapping: each input pixel emits a
    # 2x2 output patch -> one matmul against weight [Cin, (dy,dx)*Cout].
    # PyTorch weight layout is [Cin, Cout, kH, kW].
    dw = jnp.transpose(params["deconv_w"], (0, 2, 3, 1)).reshape(c, 4 * hidden)
    db = jnp.tile(params["deconv_b"], 4)            # bias per (dy, dx) position

    # 1x1 conv weight [C_out, C_in, 1, 1] -> [hidden, kpad] (zero lane-padded)
    lw = params["logits_w"].reshape(num_classes, hidden).T
    lw = jnp.pad(lw, ((0, 0), (0, kpad - num_classes)))
    lb = jnp.pad(params["logits_b"], (0, kpad - num_classes))

    m = n * h * w
    row_tile = _pick_row_tile(m, cap=256)           # ~12 MiB/step working set
    m_pad = _round_up(m, row_tile)

    x_p = jnp.pad(x, ((0, m_pad - m), (0, 0))).astype(jnp.bfloat16)
    dw_b = dw.astype(jnp.bfloat16)
    lw_b = lw.astype(jnp.bfloat16)
    db2 = db.reshape(1, 4 * hidden).astype(jnp.float32)
    lb2 = lb.reshape(1, kpad).astype(jnp.float32)

    out = pl.pallas_call(
        functools.partial(_mask_head_kernel, hidden=hidden, kpad=kpad),
        out_shape=jax.ShapeDtypeStruct((m_pad, 4 * kpad), jnp.float32),
        grid_spec=pltpu.PrefetchScalarGridSpec(
            num_scalar_prefetch=0,
            grid=(m_pad // row_tile,),
            in_specs=[
                pl.BlockSpec((row_tile, c), lambda i: (i, 0)),
                pl.BlockSpec((c, 4 * hidden), lambda i: (0, 0)),
                pl.BlockSpec((1, 4 * hidden), lambda i: (0, 0)),
                pl.BlockSpec((hidden, kpad), lambda i: (0, 0)),
                pl.BlockSpec((1, kpad), lambda i: (0, 0)),
            ],
            out_specs=pl.BlockSpec((row_tile, 4 * kpad), lambda i: (i, 0)),
        ),
        compiler_params=pltpu.CompilerParams(
            dimension_semantics=("parallel",),
            vmem_limit_bytes=_VMEM_LIMIT),
    )(x_p, dw_b, db2, lw_b, lb2)

    # Pixel shuffle now happens on the tiny num_classes-wide output (~60 KiB),
    # not the 4096-wide intermediate.
    out = out[:m]                                           # drop row padding
    out = out.reshape(n, h, w, 2, 2, kpad)[..., :num_classes]
    out = jnp.transpose(out, (0, 1, 3, 2, 4, 5)).reshape(
        n, 2 * h, 2 * w, num_classes)
    return jnp.transpose(out, (0, 3, 1, 2))                 # back to NCHW


# ----------------------------------------------------------------------------
# Pure-jnp f32 references (same math, no Pallas) for correctness checking.
# ----------------------------------------------------------------------------
def _ref_box(box_features, params):
    s = box_features @ params["cls_w"] + params["cls_b"]
    d = box_features @ params["bbox_w"] + params["bbox_b"]
    return s, d


def _ref_mask(xm, params, num_classes):
    n, c, h, w = xm.shape
    hidden = params["deconv_w"].shape[1]
    # y[n, o, 2h+dy, 2w+dx] = sum_c x[n,c,h,w] * W[c,o,dy,dx] + b[o]
    y = jnp.einsum("nchw,coyx->nohywx", xm, params["deconv_w"])
    y = y.reshape(n, hidden, 2 * h, 2 * w) + params["deconv_b"][None, :, None, None]
    y = jnp.maximum(y, 0.0)
    lw = params["logits_w"].reshape(num_classes, hidden)
    return jnp.einsum("nchw,kc->nkhw", y, lw) + params["logits_b"][None, :, None, None]


def _rel_err(a, b):
    return float(jnp.max(jnp.abs(a - b)) / (jnp.max(jnp.abs(b)) + 1e-6))


# ----------------------------------------------------------------------------
if __name__ == "__main__":
    num_classes = 5            # e.g. waste categories + background
    in_features = 1024         # FastRCNNPredictor in_features (FPN-v2 box head)
    in_features_mask = 256     # mask_predictor.conv5_mask.in_channels
    hidden_layer = 1024        # as hard-coded in WasteMaskRCNN
    num_box_rois = 8
    num_mask_rois = 4
    mask_roi_size = 14         # standard Mask R-CNN mask RoIAlign output

    key = jax.random.PRNGKey(0)
    keys = iter(jax.random.split(key, 10))
    params = {
        "cls_w": 0.02 * jax.random.normal(next(keys), (in_features, num_classes), jnp.float32),
        "cls_b": 0.01 * jax.random.normal(next(keys), (num_classes,), jnp.float32),
        "bbox_w": 0.02 * jax.random.normal(next(keys), (in_features, 4 * num_classes), jnp.float32),
        "bbox_b": 0.01 * jax.random.normal(next(keys), (4 * num_classes,), jnp.float32),
        "deconv_w": 0.02 * jax.random.normal(
            next(keys), (in_features_mask, hidden_layer, 2, 2), jnp.float32),
        "deconv_b": 0.01 * jax.random.normal(next(keys), (hidden_layer,), jnp.float32),
        "logits_w": 0.02 * jax.random.normal(
            next(keys), (num_classes, hidden_layer, 1, 1), jnp.float32),
        "logits_b": 0.01 * jax.random.normal(next(keys), (num_classes,), jnp.float32),
    }

    box_features = jax.random.normal(next(keys), (num_box_rois, in_features), jnp.float32)
    mask_features = jax.random.normal(
        next(keys), (num_mask_rois, in_features_mask, mask_roi_size, mask_roi_size),
        jnp.float32)

    scores, deltas = fast_rcnn_predictor(box_features, params)
    mask_logits = mask_rcnn_predictor(mask_features, params, num_classes)
    jax.block_until_ready((scores, deltas, mask_logits))

    assert scores.shape == (num_box_rois, num_classes)
    assert deltas.shape == (num_box_rois, 4 * num_classes)
    assert mask_logits.shape == (num_mask_rois, num_classes, 2 * mask_roi_size, 2 * mask_roi_size)

    # numerical check against pure-jnp f32 references
    # (bf16 MXU operands with f32 accumulation -> loosened tolerances)
    s_ref, d_ref = _ref_box(box_features, params)
    m_ref = _ref_mask(mask_features, params, num_classes)
    assert _rel_err(scores, s_ref) < 5e-2
    assert _rel_err(deltas, d_ref) < 5e-2
    assert _rel_err(mask_logits, m_ref) < 5e-2

    print("KERNEL_OK")
</pallas_src>

<mosaic_0001>
module attributes {stable_mosaic.version = 11 : i64} {
  func.func @_linear_kernel(%arg0: i32, %arg1: memref<16x1024xbf16, #tpu.memory_space<vmem>>, %arg2: memref<1024x128xbf16, #tpu.memory_space<vmem>>, %arg3: memref<1x128xf32, #tpu.memory_space<vmem>>, %arg4: memref<16x128xf32, #tpu.memory_space<vmem>>) attributes {dimension_semantics = [#tpu.dimension_semantics<parallel>], iteration_bounds = array<i64: 1>, scalar_prefetch = 0 : i64, scratch_operands = 0 : i64, tpu.core_type = #tpu.core_type<tc>, window_params = [{transform_indices = @transform_0, window_bounds = array<i64: 16, 1024>}, {pipeline_mode = #tpu.pipeline_mode<synchronous>, transform_indices = @transform_1, window_bounds = array<i64: 1024, 128>}, {pipeline_mode = #tpu.pipeline_mode<synchronous>, transform_indices = @transform_2, window_bounds = array<i64: 1, 128>}, {transform_indices = @transform_3, window_bounds = array<i64: 16, 128>}]} {
    %c0 = arith.constant 0 : index
    %c0_0 = arith.constant 0 : index
    %0 = vector.load %arg1[%c0, %c0_0] : memref<16x1024xbf16, #tpu.memory_space<vmem>>, vector<16x1024xbf16>
    %c0_1 = arith.constant 0 : index
    %c0_2 = arith.constant 0 : index
    %1 = vector.load %arg2[%c0_1, %c0_2] : memref<1024x128xbf16, #tpu.memory_space<vmem>>, vector<1024x128xbf16>
    %cst = arith.constant dense<0.000000e+00> : vector<16x128xf32>
    %2 = tpu.matmul %0, %1, %cst {dimension_numbers = #tpu.dot_dimension_numbers<[1], [0], [0], [1], [0, 0, 1, 1], [], []>} : vector<16x1024xbf16>, vector<1024x128xbf16>, vector<16x128xf32> -> vector<16x128xf32>
    %c0_3 = arith.constant 0 : index
    %c0_4 = arith.constant 0 : index
    %3 = vector.load %arg3[%c0_3, %c0_4] : memref<1x128xf32, #tpu.memory_space<vmem>>, vector<1x128xf32>
    %4 = vector.broadcast %3 : vector<1x128xf32> to vector<16x128xf32>
    %5 = arith.addf %2, %4 : vector<16x128xf32>
    %c0_5 = arith.constant 0 : index
    %c0_6 = arith.constant 0 : index
    %6 = vector.load %arg4[%c0_5, %c0_6] : memref<16x128xf32, #tpu.memory_space<vmem>>, vector<16x128xf32>
    tpu.vector_store %arg4[%c0_5, %c0_6], %5 {strides = array<i32>} : memref<16x128xf32, #tpu.memory_space<vmem>>, vector<16x128xf32>,
    return
  }
  func.func @transform_0(%arg0: i32) -> (i32, i32) {
    %c0_i32 = arith.constant 0 : i32
    %c0_i32_0 = arith.constant 0 : i32
    return %arg0, %c0_i32 : i32, i32
  }
  func.func @transform_1(%arg0: i32) -> (i32, i32) {
    %c0_i32 = arith.constant 0 : i32
    %c0_i32_0 = arith.constant 0 : i32
    %c0_i32_1 = arith.constant 0 : i32
    return %c0_i32, %c0_i32_0 : i32, i32
  }
  func.func @transform_2(%arg0: i32) -> (i32, i32) {
    %c0_i32 = arith.constant 0 : i32
    %c0_i32_0 = arith.constant 0 : i32
    %c0_i32_1 = arith.constant 0 : i32
    return %c0_i32, %c0_i32_0 : i32, i32
  }
  func.func @transform_3(%arg0: i32) -> (i32, i32) {
    %c0_i32 = arith.constant 0 : i32
    %c0_i32_0 = arith.constant 0 : i32
    return %arg0, %c0_i32 : i32, i32
  }
}

</mosaic_0001>

<bundles_post_ra>
// kernel: tpu_custom_call.1
= control target key start
LH: loop header
LB: loop body
LE: loop exit
PB: predicated region body
PF: predicated region fallthrough
CT: control target
= control target key end

     0   :  { %8 = vsyncpa [#allocation3], 0  ;;  %s1234_s0 = inlined_call_operand.hbm [shape: bf16[16,1024], index: 0, kind: input, shape index: {}]   ;;  %s1235_s1 = inlined_call_operand.hbm [shape: bf16[1024,128], index: 1, kind: input, shape index: {}]   ;;  %s1236_s2 = inlined_call_operand.vmem [shape: f32[1,128], index: 2, kind: input, shape index: {}]   ;;  %s1237_s3 = inlined_call_operand.hbm [shape: f32[16,128], index: 3, kind: output, shape index: {}]  }
   0x1   :  { %9 = vsyncpa [#allocation6], 0 }
   0x2   :  { %10 = vsyncpa [#allocation4], 0  ;;  %s15_s14 = sshll.u32 %s1234_s0, 4  ;;  %s1193_s15 = smov [#allocation2]   ;;  %s16_s14 = int_to_ptr.hbm [resolvable:$true] %s15_s14 }
   0x3   :  { %s17_s16 = sshll.u32 %s1193_s15, 4  ;;  %s28_s19 = sshll.u32 %s1235_s1, 4  ;;  %s18_s16 = int_to_ptr.vmem [resolvable:$true] %s17_s16  ;;  %s29_s19 = int_to_ptr.hbm [resolvable:$true] %s28_s19 }
   0x4   :  { %s1194_s20 = smov 512   ;;  %s1195_s21 = smov 32  }
   0x5   :  { %23 = dma.hbm_to_vmem [thread:$0]  %s16_s14, 1024, %s18_s16, [#allocation3], %s1194_s20, %s1194_s20, %s1195_s21  }
   0x6   :  { %s1196_s22 = smov [#allocation5]   ;;  %s1197_s24 = smov 64  }
   0x7   :  { %s30_s23 = sshll.u32 %s1196_s22, 4  ;;  %s1198_s25 = smov 4   ;;  %s31_s23 = int_to_ptr.vmem [resolvable:$true] %s30_s23 }
   0x8   :  { %36 = dma.hbm_to_vmem [thread:$0]  %s29_s19, 8192, %s31_s23, [#allocation6], %s1197_s24, %s1197_s24, %s1198_s25  }
   0x9   :  { %1187 = dma.done.wait [#allocation3], 1024  }
   0xa   :  { %1188 = vsyncadd [#allocation3], 4294966272 }
   0xb   :  { %1189 = dma.done.wait [#allocation6], 8192  }
   0xc   :  { %1190 = vsyncadd [#allocation6], 4294959104  ;;  %v1048_v0 = vld [vmem:[#allocation5 + $0x38] sm:$0xff]  ;;  %v1047_v4 = vld [vmem:[#allocation5 + $0x30] sm:$0xff]  ;;  %s731_s29 = sshll.u32 %s1237_s3, 4  ;;  %s1200_s30 = smov 128   ;;  %s732_s29 = int_to_ptr.hbm [resolvable:$true] %s731_s29 }
   0xd   :  { %v1056_v1 = vld [vmem:[#allocation5 + $0x78] sm:$0xff]  ;;  %611 = vmatpush.bf16.msra.mxu0 %v1048_v0  ;;  %v1055_v5 = vld [vmem:[#allocation5 + $0x70] sm:$0xff]  ;;  %v1046_v8 = vld [vmem:[#allocation5 + $0x28] sm:$0xff]  ;;  %s1201_s4 = smov 8  }
   0xe   :  { %v1064_v2 = vld [vmem:[#allocation5 + $0xb8] sm:$0xff]  ;;  %625 = vmatpush.bf16.msra.mxu1 %v1056_v1  ;;  %v1063_v6 = vld [vmem:[#allocation5 + $0xb0] sm:$0xff]  ;;  %v1054_v9 = vld [vmem:[#allocation5 + $0x68] sm:$0xff] }
   0xf   :  { %v1072_v3 = vld [vmem:[#allocation5 + $0xf8] sm:$0xff]  ;;  %639 = vmatpush.bf16.msra.mxu2 %v1064_v2  ;;  %v1071_v7 = vld [vmem:[#allocation5 + $0xf0] sm:$0xff]  ;;  %v1062_v10 = vld [vmem:[#allocation5 + $0xa8] sm:$0xff] }
  0x10   :  { %653 = vmatpush.bf16.msra.mxu3 %v1072_v3  ;;  %v1070_v11 = vld [vmem:[#allocation5 + $0xe8] sm:$0xff]  ;;  %v1045_v12 = vld [vmem:[#allocation5 + $0x20] sm:$0xff]  ;;  %v1044_v16 = vld [vmem:[#allocation5 + $0x18] sm:$0xff] }
  0x11   :  { %612 = vmatpush.bf16.msra.mxu0 %v1047_v4  ;;  %v1053_v13 = vld [vmem:[#allocation5 + $0x60] sm:$0xff]  ;;  %v1052_v17 = vld [vmem:[#allocation5 + $0x58] sm:$0xff]  ;;  %v1043_v20 = vld [vmem:[#allocation5 + $0x10] sm:$0xff] }
  0x12   :  { %626 = vmatpush.bf16.msra.mxu1 %v1055_v5  ;;  %v1061_v14 = vld [vmem:[#allocation5 + $0xa0] sm:$0xff]  ;;  %v1060_v18 = vld [vmem:[#allocation5 + $0x98] sm:$0xff]  ;;  %v1051_v21 = vld [vmem:[#allocation5 + $0x50] sm:$0xff] }
  0x13   :  { %640 = vmatpush.bf16.msra.mxu2 %v1063_v6  ;;  %v1069_v15 = vld [vmem:[#allocation5 + $0xe0] sm:$0xff]  ;;  %v1068_v19 = vld [vmem:[#allocation5 + $0xd8] sm:$0xff]  ;;  %v1059_v22 = vld [vmem:[#allocation5 + $0x90] sm:$0xff] }
  0x14   :  { %654 = vmatpush.bf16.msra.mxu3 %v1071_v7  ;;  %v1067_v23 = vld [vmem:[#allocation5 + $0xd0] sm:$0xff]  ;;  %v1042_v24 = vld [vmem:[#allocation5 + $0x8] sm:$0xff]  ;;  %v1041_v28 = vld [vmem:[#allocation5] sm:$0xff] }
  0x15   :  { %613 = vmatpush.bf16.msra.mxu0 %v1046_v8  ;;  %v1050_v25 = vld [vmem:[#allocation5 + $0x48] sm:$0xff]  ;;  %v1049_v29 = vld [vmem:[#allocation5 + $0x40] sm:$0xff]  ;;  %v1080_v32 = vld [vmem:[#allocation5 + $0x138] sm:$0xff] }
  0x16   :  { %627 = vmatpush.bf16.msra.mxu1 %v1054_v9  ;;  %v1058_v26 = vld [vmem:[#allocation5 + $0x88] sm:$0xff]  ;;  %v1057_v30 = vld [vmem:[#allocation5 + $0x80] sm:$0xff]  ;;  %v1088_v33 = vld [vmem:[#allocation5 + $0x178] sm:$0xff] }
  0x17   :  { %641 = vmatpush.bf16.msra.mxu2 %v1062_v10  ;;  %v1066_v27 = vld [vmem:[#allocation5 + $0xc8] sm:$0xff]  ;;  %v1065_v31 = vld [vmem:[#allocation5 + $0xc0] sm:$0xff]  ;;  %v1096_v42 = vld [vmem:[#allocation5 + $0x1b8] sm:$0xff] }
  0x18   :  { %655 = vmatpush.bf16.msra.mxu3 %v1070_v11  ;;  %v755_v34 = vld [vmem:[#allocation2 + $0x8] sm:$0xf]  ;;  %v747_v36 = vld [vmem:[#allocation2] sm:$0xf]  ;;  %v1034_v38 = vld [vmem:[#allocation2 + $0xc] sm:$0xf] }
  0x19   :  { %614 = vmatpush.bf16.msra.mxu0 %v1045_v12  ;;  %v1038_v35 = vld [vmem:[#allocation2 + $0x24] sm:$0xf0]  ;;  %v1037_v37 = vld [vmem:[#allocation2 + $0x1c] sm:$0xf0]  ;;  %v757_v39 = vld [vmem:[#allocation2 + $0x28] sm:$0xf0] }
  0x1a   :  { %628 = vmatpush.bf16.msra.mxu1 %v1053_v13  ;;  %v1033_v40 = vld [vmem:[#allocation2 + $0x4] sm:$0xf]  ;;  %v1104_v43 = vld [vmem:[#allocation5 + $0x1f8] sm:$0xff]  ;;  %v756_v44 = vor.u32 %v1038_v35, %v755_v34  ;;  %v748_v45 = vor.u32 %v1037_v37, %v747_v36  ;;  %v760_v46 = vor.u32 %v1034_v38, %v757_v39  ;;  %v1079_v48 = vld [vmem:[#allocation5 + $0x130] sm:$0xff] }
  0x1b   :  { %642 = vmatpush.bf16.msra.mxu2 %v1061_v14  ;;  %v749_v41 = vld [vmem:[#allocation2 + $0x20] sm:$0xf0]  ;;  %v1087_v49 = vld [vmem:[#allocation5 + $0x170] sm:$0xff]  ;;  %v1078_v52 = vld [vmem:[#allocation5 + $0x128] sm:$0xff] }
  0x1c   :  { %656 = vmatpush.bf16.msra.mxu3 %v1069_v15  ;;  %v752_v47 = vor.u32 %v1033_v40, %v749_v41  ;;  %v1095_v50 = vld [vmem:[#allocation5 + $0x1b0] sm:$0xff]  ;;  %v1086_v53 = vld [vmem:[#allocation5 + $0x168] sm:$0xff]  ;;  %v1077_v56 = vld [vmem:[#allocation5 + $0x120] sm:$0xff] }
  0x1d   :  { %615 = vmatpush.bf16.msra.mxu0 %v1044_v16  ;;  %v1103_v51 = vld [vmem:[#allocation5 + $0x1f0] sm:$0xff]  ;;  %v1094_v54 = vld [vmem:[#allocation5 + $0x1a8] sm:$0xff]  ;;  %v1085_v57 = vld [vmem:[#allocation5 + $0x160] sm:$0xff] }
  0x1e   :  { %629 = vmatpush.bf16.msra.mxu1 %v1052_v17  ;;  %v1102_v55 = vld [vmem:[#allocation5 + $0x1e8] sm:$0xff]  ;;  %v1093_v58 = vld [vmem:[#allocation5 + $0x1a0] sm:$0xff]  ;;  %v1076_v60 = vld [vmem:[#allocation5 + $0x118] sm:$0xff] }
  0x1f   :  { %643 = vmatpush.bf16.msra.mxu2 %v1060_v18  ;;  %v1101_v59 = vld [vmem:[#allocation5 + $0x1e0] sm:$0xff]  ;;  %v1084_v61 = vld [vmem:[#allocation5 + $0x158] sm:$0xff]  ;;  %v1075_v0 = vld [vmem:[#allocation5 + $0x110] sm:$0xff] }
  0x20   :  { %657 = vmatpush.bf16.msra.mxu3 %v1068_v19  ;;  %v1092_v62 = vld [vmem:[#allocation5 + $0x198] sm:$0xff]  ;;  %v1083_v1 = vld [vmem:[#allocation5 + $0x150] sm:$0xff]  ;;  %v1074_v4 = vld [vmem:[#allocation5 + $0x108] sm:$0xff] }
  0x21   :  { %616 = vmatpush.bf16.msra.mxu0 %v1043_v20  ;;  %v1100_v63 = vld [vmem:[#allocation5 + $0x1d8] sm:$0xff]  ;;  %v1091_v2 = vld [vmem:[#allocation5 + $0x190] sm:$0xff]  ;;  %v1082_v5 = vld [vmem:[#allocation5 + $0x148] sm:$0xff] }
  0x22   :  { %630 = vmatpush.bf16.msra.mxu1 %v1051_v21  ;;  %v1099_v3 = vld [vmem:[#allocation5 + $0x1d0] sm:$0xff]  ;;  %v1090_v6 = vld [vmem:[#allocation5 + $0x188] sm:$0xff]  ;;  %v1073_v8 = vld [vmem:[#allocation5 + $0x100] sm:$0xff] }
  0x23   :  { %644 = vmatpush.bf16.msra.mxu2 %v1059_v22  ;;  %v1098_v7 = vld [vmem:[#allocation5 + $0x1c8] sm:$0xff]  ;;  %v1081_v9 = vld [vmem:[#allocation5 + $0x140] sm:$0xff]  ;;  %v763_v12 = vld [vmem:[#allocation2 + $0x10] sm:$0xf] }
  0x24   :  { %658 = vmatpush.bf16.msra.mxu3 %v1067_v23  ;;  %v1089_v10 = vld [vmem:[#allocation5 + $0x180] sm:$0xff]  ;;  %v1039_v13 = vld [vmem:[#allocation2 + $0x2c] sm:$0xf0]  ;;  %v1035_v14 = vld [vmem:[#allocation2 + $0x14] sm:$0xf] }
  0x25   :  { %617 = vmatpush.bf16.msra.mxu0 %v1042_v24  ;;  %v1097_v11 = vld [vmem:[#allocation5 + $0x1c0] sm:$0xff]  ;;  %v765_v15 = vld [vmem:[#allocation2 + $0x30] sm:$0xf0]  ;;  %v771_v16 = vld [vmem:[#allocation2 + $0x18] sm:$0xf]  ;;  %v764_v20 = vor.u32 %v1039_v13, %v763_v12 }
  0x26   :  { %631 = vmatpush.bf16.msra.mxu1 %v1050_v25  ;;  %v1040_v17 = vld [vmem:[#allocation2 + $0x34] sm:$0xf0]  ;;  %v1036_v18 = vld [vmem:[#allocation2 + $0x1c] sm:$0xf]  ;;  %v768_v21 = vor.u32 %v1035_v14, %v765_v15  ;;  %v1114_v25 = vld [vmem:[%s1236_s2] ss:$0 sm:$0xff] }
  0x27   :  { %645 = vmatpush.bf16.msra.mxu2 %v1058_v26  ;;  %v773_v19 = vld [vmem:[#allocation2 + $0x38] sm:$0xf0]  ;;  %v772_v22 = vor.u32 %v1040_v17, %v771_v16  ;;  %s1199_s2 = smov [#allocation7]  }
  0x28   :  { %659 = vmatpush.bf16.msra.mxu3 %v1066_v27  ;;  %v776_v23 = vor.u32 %v1036_v18, %v773_v19  ;;  %s729_s26 = sshll.u32 %s1199_s2, 4  ;;  %s730_s26 = int_to_ptr.vmem [resolvable:$true] %s729_s26 }
  0x29   :  { %618 = vmatpush.bf16.msra.mxu0 %v1041_v28 }
  0x2a   :  { %632 = vmatpush.bf16.msra.mxu1 %v1049_v29 }
  0x2b   :  { %646 = vmatpush.bf16.msra.mxu2 %v1057_v30 }
  0x2c   :  { %660 = vmatpush.bf16.msra.mxu3 %v1065_v31  ;;  %619 = vmatmul.bf16.vlgmr.msra.gmra.mxu0 %v748_v45 }
  0x2d   :  { %667 = vmatpush.bf16.msrb.mxu0 %v1080_v32  ;;  %633 = vmatmul.bf16.vlgmr.msra.gmra.mxu1 %v752_v47 }
  0x2e   :  { %681 = vmatpush.bf16.msrb.mxu1 %v1088_v33  ;;  %647 = vmatmul.bf16.vlgmr.msra.gmra.mxu2 %v756_v44 }
  0x2f   :  { %695 = vmatpush.bf16.msrb.mxu2 %v1096_v42  ;;  %661 = vmatmul.bf16.vlgmr.msra.gmra.mxu3 %v760_v46 }
  0x30   :  { %709 = vmatpush.bf16.msrb.mxu3 %v1104_v43 }
  0x31   :  { %668 = vmatpush.bf16.msrb.mxu0 %v1079_v48 }
  0x32   :  { %682 = vmatpush.bf16.msrb.mxu1 %v1087_v49 }
  0x33   :  { %696 = vmatpush.bf16.msrb.mxu2 %v1095_v50 }
  0x34   :  { %710 = vmatpush.bf16.msrb.mxu3 %v1103_v51 }
  0x35   :  { %669 = vmatpush.bf16.msrb.mxu0 %v1078_v52 }
  0x36   :  { %683 = vmatpush.bf16.msrb.mxu1 %v1086_v53 }
  0x37   :  { %697 = vmatpush.bf16.msrb.mxu2 %v1094_v54 }
  0x38   :  { %711 = vmatpush.bf16.msrb.mxu3 %v1102_v55 }
  0x39   :  { %670 = vmatpush.bf16.msrb.mxu0 %v1077_v56 }
  0x3a   :  { %684 = vmatpush.bf16.msrb.mxu1 %v1085_v57 }
  0x3b   :  { %698 = vmatpush.bf16.msrb.mxu2 %v1093_v58 }
  0x3c   :  { %712 = vmatpush.bf16.msrb.mxu3 %v1101_v59 }
  0x3d   :  { %671 = vmatpush.bf16.msrb.mxu0 %v1076_v60 }
  0x3e   :  { %685 = vmatpush.bf16.msrb.mxu1 %v1084_v61 }
  0x3f   :  { %699 = vmatpush.bf16.msrb.mxu2 %v1092_v62 }
  0x40   :  { %713 = vmatpush.bf16.msrb.mxu3 %v1100_v63 }
  0x41   :  { %672 = vmatpush.bf16.msrb.mxu0 %v1075_v0 }
  0x42   :  { %686 = vmatpush.bf16.msrb.mxu1 %v1083_v1 }
  0x43   :  { %700 = vmatpush.bf16.msrb.mxu2 %v1091_v2 }
  0x44   :  { %714 = vmatpush.bf16.msrb.mxu3 %v1099_v3 }
  0x45   :  { %673 = vmatpush.bf16.msrb.mxu0 %v1074_v4 }
  0x46   :  { %687 = vmatpush.bf16.msrb.mxu1 %v1082_v5 }
  0x47   :  { %701 = vmatpush.bf16.msrb.mxu2 %v1090_v6 }
  0x48   :  { %715 = vmatpush.bf16.msrb.mxu3 %v1098_v7 }
  0x49   :  { %674 = vmatpush.bf16.msrb.mxu0 %v1073_v8 }
  0x4a   :  { %688 = vmatpush.bf16.msrb.mxu1 %v1081_v9 }
  0x4b   :  { %702 = vmatpush.bf16.msrb.mxu2 %v1089_v10 }
  0x4c   :  { %716 = vmatpush.bf16.msrb.mxu3 %v1097_v11  ;;  %675 = vmatmul.bf16.vlgmr.msrb.gmra.mxu0 %v764_v20 }
  0x4d   :  { %689 = vmatmul.bf16.vlgmr.msrb.gmra.mxu1 %v768_v21 }
  0x4e   :  { %703 = vmatmul.bf16.vlgmr.msrb.gmra.mxu2 %v772_v22 }
  0x4f   :  { %717 = vmatmul.bf16.vlgmr.msrb.gmra.mxu3 %v776_v23 }
  0xa9   :  { %v620_v24 = vpop.f32.mrf.mxu0 }
  0xaa   :  { %v634_v26 = vpop.f32.mrf.mxu1  ;;  %v621_v27 = vadd.f32 %v1114_v25, %v620_v24 }
  0xac   :  { %v635_v30 = vadd.f32 %v634_v26, %v621_v27 }
  0xb1   :  { %v648_v28 = vpop.f32.mrf.mxu2  ;;  %v622_v31 = vpop.f32.mrf.mxu0 }
  0xb2   :  { %v662_v29 = vpop.f32.mrf.mxu3  ;;  %v636_v32 = vpop.f32.mrf.mxu1  ;;  %v649_v33 = vadd.f32 %v648_v28, %v635_v30  ;;  %v623_v34 = vadd.f32 %v1114_v25, %v622_v31 }
  0xb4   :  { %v663_v37 = vadd.f32 %v662_v29, %v649_v33  ;;  %v637_v38 = vadd.f32 %v636_v32, %v623_v34 }
  0xb9   :  { %v650_v35 = vpop.f32.mrf.mxu2 }
  0xba   :  { %v664_v36 = vpop.f32.mrf.mxu3  ;;  %v651_v42 = vadd.f32 %v650_v35, %v637_v38 }
  0xbc   :  { %v665_v46 = vadd.f32 %v664_v36, %v651_v42 }
  0xc9   :  { %v676_v39 = vpop.f32.mrf.mxu0 }
  0xca   :  { %v677_v40 = vadd.f32 %v676_v39, %v663_v37  ;;  %v690_v41 = vpop.f32.mrf.mxu1 }
  0xcc   :  { %v691_v43 = vadd.f32 %v690_v41, %v677_v40 }
  0xd1   :  { %v704_v44 = vpop.f32.mrf.mxu2  ;;  %v678_v48 = vpop.f32.mrf.mxu0 }
  0xd2   :  { %v718_v45 = vpop.f32.mrf.mxu3  ;;  %v705_v47 = vadd.f32 %v704_v44, %v691_v43  ;;  %v679_v50 = vadd.f32 %v678_v48, %v665_v46  ;;  %v692_v51 = vpop.f32.mrf.mxu1 }
  0xd4   :  { %v719_v49 = vadd.f32 %v718_v45, %v705_v47  ;;  %v693_v52 = vadd.f32 %v692_v51, %v679_v50 }
  0xd6   :  { %723 = vst [vmem:[#allocation7] sm:$0xff] %v719_v49 }
  0xd9   :  { %v706_v53 = vpop.f32.mrf.mxu2 }
  0xda   :  { %v707_v54 = vadd.f32 %v706_v53, %v693_v52  ;;  %v720_v55 = vpop.f32.mrf.mxu3 }
  0xdc   :  { %v721_v56 = vadd.f32 %v720_v55, %v707_v54 }
  0xde   :  { %724 = vst [vmem:[#allocation7 + $0x8] sm:$0xff] %v721_v56 }
  0xdf   :  { %737 = dma.vmem_to_hbm [thread:$0]  %s730_s26, 256, %s732_s29, [#allocation4], %s1200_s30, %s1200_s30, %s1201_s4  }
  0xe0   :  { %1191 = dma.done.wait [#allocation4], 256  }
  0xe1   :  { %1192 = vsyncadd [#allocation4], 4294967040 }
  0xe2   :  { %742 = vsyncpa [#allocation3], 1 }
  0xe3   :  { %743 = vsyncpa [#allocation6], 1 }
  0xe4   :  { %744 = vsyncpa [#allocation4], 1 }

</bundles_post_ra>
